<compile_context>
chip_gen: v7x
topology: tpu7x:2x2x1
jax: 0.10.0
libtpu: 0.0.40
codegen_flags: <defaults>
</compile_context>

<pallas_src>
import functools

import jax
import jax.numpy as jnp
from jax import lax
from jax.experimental import pallas as pl
from jax.experimental.pallas import tpu as pltpu


def _round_up(x, m):
    return ((x + m - 1) // m) * m


def _block_diag(w, n):
    k, m = w.shape
    out = jnp.zeros((n * k, n * m), w.dtype)
    for i in range(n):
        out = out.at[i * k:(i + 1) * k, i * m:(i + 1) * m].set(w)
    return out


def pack_params(params, *, pack=4, compute_dtype=jnp.bfloat16):
    """One-time weight prep: f32 layer-1 weights (VPU path) and block-diagonal
    bf16 weights for the packed MXU layers."""
    w1, b1, w2, b2, w3, b3 = params
    w1f = w1.astype(jnp.float32)                                   # (6, 64)
    b1f = b1.reshape(1, -1).astype(jnp.float32)                    # (1, 64)
    w2b = _block_diag(w2, pack).astype(compute_dtype)              # (256, 256)
    b2b = jnp.tile(b2.reshape(1, -1).astype(jnp.float32), (1, pack))   # (1, 256)
    w3b = _block_diag(w3, pack).astype(compute_dtype)              # (256, 24)
    b3b = jnp.tile(b3.reshape(1, -1).astype(jnp.float32), (1, pack))   # (1, 24)
    return (w1f, b1f, w2b, b2b, w3b, b3b)


def _mlp_kernel(x_ref, w1_ref, b1_ref, w2_ref, b2_ref, w3_ref, b3_ref,
                o_ref, h1_ref, *, pack, in_dim, h1_dim):
    # x_ref: (tbp, pack*in_dim) f32 -- `pack` original batch rows per packed row.
    xp = x_ref[...].astype(jnp.float32)
    w1 = w1_ref[...]                       # (in_dim, h1_dim) f32
    b1 = b1_ref[...]                       # (1, h1_dim) f32

    # ---- Layer 1 on the VPU (K=6 is wasted on the MXU) --------------------
    # h1 for sub-batch j = sum_k x[:, j*in_dim+k] * w1[k, :]  (broadcast FMAs);
    # results land in the packed lane layout [ .., 64*j + c, .. ] of the scratch.
    for j in range(pack):
        acc = jnp.zeros((xp.shape[0], h1_dim), jnp.float32)
        for k in range(in_dim):
            m = j * in_dim + k
            acc = acc + xp[:, m:m + 1] * w1[k:k + 1, :]
        h1_ref[:, j * h1_dim:(j + 1) * h1_dim] = jnp.maximum(acc + b1, 0.0)

    cdt = w2_ref.dtype
    h1 = h1_ref[...].astype(cdt)           # (tbp, pack*h1_dim) bf16

    # ---- Layers 2 & 3 on the MXU with block-diagonal packed weights -------
    h2 = jnp.dot(h1, w2_ref[...], preferred_element_type=jnp.float32) + b2_ref[...]
    h2 = jnp.maximum(h2, 0.0)
    out = jnp.dot(h2.astype(w3_ref.dtype), w3_ref[...],
                  preferred_element_type=jnp.float32) + b3_ref[...]
    o_ref[...] = out.astype(o_ref.dtype)


def mlp_forward(x, packed_params, *, block_rows=4096):
    """Fused MLP forward. x: (B, 6) -> (B, 6)."""
    w1f, b1f, w2b, b2b, w3b, b3b = packed_params
    in_dim, h1_dim = w1f.shape
    pack = w2b.shape[0] // h1_dim
    h2_dim = w2b.shape[1] // pack
    out_dim = w3b.shape[1] // pack
    B = x.shape[0]
    out_dtype = x.dtype

    # Pad only to the next multiple of `pack` (usually a no-op), then pack `pack`
    # consecutive rows into the lane axis with a free row-major reshape.
    Bp = _round_up(B, pack)
    if Bp != B:
        x = jnp.pad(x, ((0, Bp - B), (0, 0)))
    rows_p = Bp // pack
    xp = x.reshape(rows_p, pack * in_dim)

    # Packed-row tile: big (amortize per-step overhead), multiple of 8 sublanes,
    # capped so the batch grid has >=2 steps when possible (v7x has 2 TensorCores).
    if rows_p <= 8:
        tbp = rows_p                        # single full-extent block
    else:
        tbp = min(max(8, block_rows // pack), (rows_p // 8) * 8)
        if rows_p >= 16:
            tbp = min(tbp, _round_up(pl.cdiv(rows_p, 2), 8))
        tbp = max(8, (tbp // 8) * 8)
    grid = (pl.cdiv(rows_p, tbp),)

    # x / out tiles move with the grid; weights & biases use constant index_maps
    # so they stay VMEM-resident across the whole grid.
    in_specs = [
        pl.BlockSpec((tbp, pack * in_dim), lambda i: (i, 0)),
        pl.BlockSpec(w1f.shape, lambda i: (0, 0)),
        pl.BlockSpec(b1f.shape, lambda i: (0, 0)),
        pl.BlockSpec(w2b.shape, lambda i: (0, 0)),
        pl.BlockSpec(b2b.shape, lambda i: (0, 0)),
        pl.BlockSpec(w3b.shape, lambda i: (0, 0)),
        pl.BlockSpec(b3b.shape, lambda i: (0, 0)),
    ]
    out_specs = pl.BlockSpec((tbp, pack * out_dim), lambda i: (i, 0))

    flops = 2 * Bp * (in_dim * h1_dim + h1_dim * h2_dim + h2_dim * out_dim)
    bytes_accessed = (
        xp.nbytes
        + Bp * out_dim * jnp.dtype(out_dtype).itemsize
        + w1f.nbytes + b1f.nbytes + w2b.nbytes + b2b.nbytes + w3b.nbytes + b3b.nbytes
    )

    kernel = functools.partial(_mlp_kernel, pack=pack, in_dim=in_dim, h1_dim=h1_dim)

    out_p = pl.pallas_call(
        kernel,
        out_shape=jax.ShapeDtypeStruct((rows_p, pack * out_dim), out_dtype),
        grid_spec=pltpu.PrefetchScalarGridSpec(
            num_scalar_prefetch=0,
            grid=grid,
            in_specs=in_specs,
            out_specs=out_specs,
            scratch_shapes=[pltpu.VMEM((tbp, pack * h1_dim), jnp.float32)],
        ),
        compiler_params=pltpu.CompilerParams(
            dimension_semantics=("parallel",),
            vmem_limit_bytes=32 * 1024 * 1024,
        ),
        cost_estimate=pl.CostEstimate(
            flops=flops, transcendentals=0, bytes_accessed=bytes_accessed,
        ),
    )(xp, w1f, b1f, w2b, b2b, w3b, b3b)

    # Free bitcast back to (Bp, out_dim); slice away pack-padding rows if any.
    return out_p.reshape(Bp, out_dim)[:B]


def init_params(key):
    """Deterministic init mirroring nn.Linear shapes (weights stored transposed)."""
    ks = jax.random.split(key, 6)

    def linear(kw, kb, fan_in, fan_out):
        bound = 1.0 / jnp.sqrt(fan_in)
        w = jax.random.uniform(kw, (fan_in, fan_out), jnp.float32, -bound, bound)
        b = jax.random.uniform(kb, (1, fan_out), jnp.float32, -bound, bound)
        return w, b

    w1, b1 = linear(ks[0], ks[1], 6, 64)
    w2, b2 = linear(ks[2], ks[3], 64, 64)
    w3, b3 = linear(ks[4], ks[5], 64, 6)
    return (w1, b1, w2, b2, w3, b3)


def mlp_ref(x, params, compute_dtype=jnp.float32):
    """Pure-JAX reference. Layer 1 in true f32 (matches the kernel's VPU path);
    layers 2/3 in `compute_dtype` operands with f32 accumulation."""
    w1, b1, w2, b2, w3, b3 = params
    hp = lax.Precision.HIGHEST
    h1 = jnp.dot(x.astype(jnp.float32), w1, precision=hp,
                 preferred_element_type=jnp.float32) + b1.reshape(1, -1)
    h1 = jnp.maximum(h1, 0.0)
    cdt = compute_dtype
    h2 = jnp.dot(h1.astype(cdt), w2.astype(cdt),
                 preferred_element_type=jnp.float32) + b2.reshape(1, -1)
    h2 = jnp.maximum(h2, 0.0)
    out = jnp.dot(h2.astype(cdt), w3.astype(cdt),
                  preferred_element_type=jnp.float32) + b3.reshape(1, -1)
    return out.astype(x.dtype)


if __name__ == "__main__":
    key = jax.random.PRNGKey(0)
    k_x, k_x2, k_x3, k_p = jax.random.split(key, 4)
    params = init_params(k_p)
    packed = pack_params(params)   # one-time weight prep (blockdiag + bf16 cast)

    # Small demo batch (multiple of the 4-way packing factor).
    x = jax.random.normal(k_x, (32, 6), jnp.float32)
    out = jax.block_until_ready(mlp_forward(x, packed))
    assert out.shape == (32, 6)
    # Same-precision reference (bf16 layer-2/3 operands, f32 accumulation).
    assert jnp.allclose(out, mlp_ref(x, params, jnp.bfloat16), atol=5e-3, rtol=5e-3)
    # Full-f32 reference (PyTorch semantics) -> loose check for bf16 rounding.
    assert jnp.allclose(out, mlp_ref(x, params, jnp.float32), atol=3e-2, rtol=3e-2)

    # Ragged batch: exercises the tiny pack-pad + full-extent (<8 row) block path.
    x2 = jax.random.normal(k_x2, (5, 6), jnp.float32)
    out2 = jax.block_until_ready(mlp_forward(x2, packed))
    assert out2.shape == (5, 6)
    assert jnp.allclose(out2, mlp_ref(x2, params, jnp.bfloat16), atol=5e-3, rtol=5e-3)

    # Multi-step grid with a partial trailing block (Pallas boundary masking).
    x3 = jax.random.normal(k_x3, (272, 6), jnp.float32)
    out3 = jax.block_until_ready(mlp_forward(x3, packed))
    assert out3.shape == (272, 6)
    assert jnp.allclose(out3, mlp_ref(x3, params, jnp.bfloat16), atol=5e-3, rtol=5e-3)

    print("KERNEL_OK")
</pallas_src>

<mosaic_0001>
module attributes {stable_mosaic.version = 11 : i64} {
  func.func @_mlp_kernel(%arg0: i32, %arg1: memref<8x24xf32, #tpu.memory_space<vmem>>, %arg2: memref<6x64xf32, #tpu.memory_space<vmem>>, %arg3: memref<1x64xf32, #tpu.memory_space<vmem>>, %arg4: memref<256x256xbf16, #tpu.memory_space<vmem>>, %arg5: memref<1x256xf32, #tpu.memory_space<vmem>>, %arg6: memref<256x24xbf16, #tpu.memory_space<vmem>>, %arg7: memref<1x24xf32, #tpu.memory_space<vmem>>, %arg8: memref<8x24xf32, #tpu.memory_space<vmem>>, %arg9: memref<8x256xf32, #tpu.memory_space<vmem>>) attributes {dimension_semantics = [#tpu.dimension_semantics<parallel>], iteration_bounds = array<i64: 1>, scalar_prefetch = 0 : i64, scratch_operands = 1 : i64, tpu.core_type = #tpu.core_type<tc>, window_params = [{transform_indices = @transform_0, window_bounds = array<i64: 8, 24>}, {pipeline_mode = #tpu.pipeline_mode<synchronous>, transform_indices = @transform_1, window_bounds = array<i64: 6, 64>}, {pipeline_mode = #tpu.pipeline_mode<synchronous>, transform_indices = @transform_2, window_bounds = array<i64: 1, 64>}, {pipeline_mode = #tpu.pipeline_mode<synchronous>, transform_indices = @transform_3, window_bounds = array<i64: 256, 256>}, {pipeline_mode = #tpu.pipeline_mode<synchronous>, transform_indices = @transform_4, window_bounds = array<i64: 1, 256>}, {pipeline_mode = #tpu.pipeline_mode<synchronous>, transform_indices = @transform_5, window_bounds = array<i64: 256, 24>}, {pipeline_mode = #tpu.pipeline_mode<synchronous>, transform_indices = @transform_6, window_bounds = array<i64: 1, 24>}, {transform_indices = @transform_7, window_bounds = array<i64: 8, 24>}]} {
    %c0 = arith.constant 0 : index
    %c0_0 = arith.constant 0 : index
    %0 = vector.load %arg1[%c0, %c0_0] : memref<8x24xf32, #tpu.memory_space<vmem>>, vector<8x24xf32>
    %c0_1 = arith.constant 0 : index
    %c0_2 = arith.constant 0 : index
    %1 = vector.load %arg2[%c0_1, %c0_2] : memref<6x64xf32, #tpu.memory_space<vmem>>, vector<6x64xf32>
    %c0_3 = arith.constant 0 : index
    %c0_4 = arith.constant 0 : index
    %2 = vector.load %arg3[%c0_3, %c0_4] : memref<1x64xf32, #tpu.memory_space<vmem>>, vector<1x64xf32>
    %cst = arith.constant 0.000000e+00 : f32
    %3 = vector.broadcast %cst : f32 to vector<8x64xf32>
    %4 = vector.extract_strided_slice %0 {offsets = [0, 0], sizes = [8, 1], strides = [1, 1]} : vector<8x24xf32> to vector<8x1xf32>
    %5 = vector.extract_strided_slice %1 {offsets = [0, 0], sizes = [1, 64], strides = [1, 1]} : vector<6x64xf32> to vector<1x64xf32>
    %6 = vector.broadcast %4 : vector<8x1xf32> to vector<8x64xf32>
    %7 = vector.broadcast %5 : vector<1x64xf32> to vector<8x64xf32>
    %8 = arith.mulf %6, %7 : vector<8x64xf32>
    %9 = arith.addf %3, %8 : vector<8x64xf32>
    %10 = vector.extract_strided_slice %0 {offsets = [0, 1], sizes = [8, 1], strides = [1, 1]} : vector<8x24xf32> to vector<8x1xf32>
    %11 = vector.extract_strided_slice %1 {offsets = [1, 0], sizes = [1, 64], strides = [1, 1]} : vector<6x64xf32> to vector<1x64xf32>
    %12 = vector.broadcast %10 : vector<8x1xf32> to vector<8x64xf32>
    %13 = vector.broadcast %11 : vector<1x64xf32> to vector<8x64xf32>
    %14 = arith.mulf %12, %13 : vector<8x64xf32>
    %15 = arith.addf %9, %14 : vector<8x64xf32>
    %16 = vector.extract_strided_slice %0 {offsets = [0, 2], sizes = [8, 1], strides = [1, 1]} : vector<8x24xf32> to vector<8x1xf32>
    %17 = vector.extract_strided_slice %1 {offsets = [2, 0], sizes = [1, 64], strides = [1, 1]} : vector<6x64xf32> to vector<1x64xf32>
    %18 = vector.broadcast %16 : vector<8x1xf32> to vector<8x64xf32>
    %19 = vector.broadcast %17 : vector<1x64xf32> to vector<8x64xf32>
    %20 = arith.mulf %18, %19 : vector<8x64xf32>
    %21 = arith.addf %15, %20 : vector<8x64xf32>
    %22 = vector.extract_strided_slice %0 {offsets = [0, 3], sizes = [8, 1], strides = [1, 1]} : vector<8x24xf32> to vector<8x1xf32>
    %23 = vector.extract_strided_slice %1 {offsets = [3, 0], sizes = [1, 64], strides = [1, 1]} : vector<6x64xf32> to vector<1x64xf32>
    %24 = vector.broadcast %22 : vector<8x1xf32> to vector<8x64xf32>
    %25 = vector.broadcast %23 : vector<1x64xf32> to vector<8x64xf32>
    %26 = arith.mulf %24, %25 : vector<8x64xf32>
    %27 = arith.addf %21, %26 : vector<8x64xf32>
    %28 = vector.extract_strided_slice %0 {offsets = [0, 4], sizes = [8, 1], strides = [1, 1]} : vector<8x24xf32> to vector<8x1xf32>
    %29 = vector.extract_strided_slice %1 {offsets = [4, 0], sizes = [1, 64], strides = [1, 1]} : vector<6x64xf32> to vector<1x64xf32>
    %30 = vector.broadcast %28 : vector<8x1xf32> to vector<8x64xf32>
    %31 = vector.broadcast %29 : vector<1x64xf32> to vector<8x64xf32>
    %32 = arith.mulf %30, %31 : vector<8x64xf32>
    %33 = arith.addf %27, %32 : vector<8x64xf32>
    %34 = vector.extract_strided_slice %0 {offsets = [0, 5], sizes = [8, 1], strides = [1, 1]} : vector<8x24xf32> to vector<8x1xf32>
    %35 = vector.extract_strided_slice %1 {offsets = [5, 0], sizes = [1, 64], strides = [1, 1]} : vector<6x64xf32> to vector<1x64xf32>
    %36 = vector.broadcast %34 : vector<8x1xf32> to vector<8x64xf32>
    %37 = vector.broadcast %35 : vector<1x64xf32> to vector<8x64xf32>
    %38 = arith.mulf %36, %37 : vector<8x64xf32>
    %39 = arith.addf %33, %38 : vector<8x64xf32>
    %40 = vector.broadcast %2 : vector<1x64xf32> to vector<8x64xf32>
    %41 = arith.addf %39, %40 : vector<8x64xf32>
    %cst_5 = arith.constant 0.000000e+00 : f32
    %42 = vector.broadcast %cst_5 : f32 to vector<8x64xf32>
    %43 = arith.maximumf %41, %42 : vector<8x64xf32>
    %c0_6 = arith.constant 0 : index
    %c0_7 = arith.constant 0 : index
    %44 = vector.load %arg9[%c0_6, %c0_7] : memref<8x256xf32, #tpu.memory_space<vmem>>, vector<8x64xf32>
    tpu.vector_store %arg9[%c0_6, %c0_7], %43 {strides = array<i32>} : memref<8x256xf32, #tpu.memory_space<vmem>>, vector<8x64xf32>,
    %cst_8 = arith.constant 0.000000e+00 : f32
    %45 = vector.broadcast %cst_8 : f32 to vector<8x64xf32>
    %46 = vector.extract_strided_slice %0 {offsets = [0, 6], sizes = [8, 1], strides = [1, 1]} : vector<8x24xf32> to vector<8x1xf32>
    %47 = vector.extract_strided_slice %1 {offsets = [0, 0], sizes = [1, 64], strides = [1, 1]} : vector<6x64xf32> to vector<1x64xf32>
    %48 = vector.broadcast %46 : vector<8x1xf32> to vector<8x64xf32>
    %49 = vector.broadcast %47 : vector<1x64xf32> to vector<8x64xf32>
    %50 = arith.mulf %48, %49 : vector<8x64xf32>
    %51 = arith.addf %45, %50 : vector<8x64xf32>
    %52 = vector.extract_strided_slice %0 {offsets = [0, 7], sizes = [8, 1], strides = [1, 1]} : vector<8x24xf32> to vector<8x1xf32>
    %53 = vector.extract_strided_slice %1 {offsets = [1, 0], sizes = [1, 64], strides = [1, 1]} : vector<6x64xf32> to vector<1x64xf32>
    %54 = vector.broadcast %52 : vector<8x1xf32> to vector<8x64xf32>
    %55 = vector.broadcast %53 : vector<1x64xf32> to vector<8x64xf32>
    %56 = arith.mulf %54, %55 : vector<8x64xf32>
    %57 = arith.addf %51, %56 : vector<8x64xf32>
    %58 = vector.extract_strided_slice %0 {offsets = [0, 8], sizes = [8, 1], strides = [1, 1]} : vector<8x24xf32> to vector<8x1xf32>
    %59 = vector.extract_strided_slice %1 {offsets = [2, 0], sizes = [1, 64], strides = [1, 1]} : vector<6x64xf32> to vector<1x64xf32>
    %60 = vector.broadcast %58 : vector<8x1xf32> to vector<8x64xf32>
    %61 = vector.broadcast %59 : vector<1x64xf32> to vector<8x64xf32>
    %62 = arith.mulf %60, %61 : vector<8x64xf32>
    %63 = arith.addf %57, %62 : vector<8x64xf32>
    %64 = vector.extract_strided_slice %0 {offsets = [0, 9], sizes = [8, 1], strides = [1, 1]} : vector<8x24xf32> to vector<8x1xf32>
    %65 = vector.extract_strided_slice %1 {offsets = [3, 0], sizes = [1, 64], strides = [1, 1]} : vector<6x64xf32> to vector<1x64xf32>
    %66 = vector.broadcast %64 : vector<8x1xf32> to vector<8x64xf32>
    %67 = vector.broadcast %65 : vector<1x64xf32> to vector<8x64xf32>
    %68 = arith.mulf %66, %67 : vector<8x64xf32>
    %69 = arith.addf %63, %68 : vector<8x64xf32>
    %70 = vector.extract_strided_slice %0 {offsets = [0, 10], sizes = [8, 1], strides = [1, 1]} : vector<8x24xf32> to vector<8x1xf32>
    %71 = vector.extract_strided_slice %1 {offsets = [4, 0], sizes = [1, 64], strides = [1, 1]} : vector<6x64xf32> to vector<1x64xf32>
    %72 = vector.broadcast %70 : vector<8x1xf32> to vector<8x64xf32>
    %73 = vector.broadcast %71 : vector<1x64xf32> to vector<8x64xf32>
    %74 = arith.mulf %72, %73 : vector<8x64xf32>
    %75 = arith.addf %69, %74 : vector<8x64xf32>
    %76 = vector.extract_strided_slice %0 {offsets = [0, 11], sizes = [8, 1], strides = [1, 1]} : vector<8x24xf32> to vector<8x1xf32>
    %77 = vector.extract_strided_slice %1 {offsets = [5, 0], sizes = [1, 64], strides = [1, 1]} : vector<6x64xf32> to vector<1x64xf32>
    %78 = vector.broadcast %76 : vector<8x1xf32> to vector<8x64xf32>
    %79 = vector.broadcast %77 : vector<1x64xf32> to vector<8x64xf32>
    %80 = arith.mulf %78, %79 : vector<8x64xf32>
    %81 = arith.addf %75, %80 : vector<8x64xf32>
    %82 = vector.broadcast %2 : vector<1x64xf32> to vector<8x64xf32>
    %83 = arith.addf %81, %82 : vector<8x64xf32>
    %cst_9 = arith.constant 0.000000e+00 : f32
    %84 = vector.broadcast %cst_9 : f32 to vector<8x64xf32>
    %85 = arith.maximumf %83, %84 : vector<8x64xf32>
    %c0_10 = arith.constant 0 : index
    %c64 = arith.constant 64 : index
    %86 = vector.load %arg9[%c0_10, %c64] : memref<8x256xf32, #tpu.memory_space<vmem>>, vector<8x64xf32>
    tpu.vector_store %arg9[%c0_10, %c64], %85 {strides = array<i32>} : memref<8x256xf32, #tpu.memory_space<vmem>>, vector<8x64xf32>,
    %cst_11 = arith.constant 0.000000e+00 : f32
    %87 = vector.broadcast %cst_11 : f32 to vector<8x64xf32>
    %88 = vector.extract_strided_slice %0 {offsets = [0, 12], sizes = [8, 1], strides = [1, 1]} : vector<8x24xf32> to vector<8x1xf32>
    %89 = vector.extract_strided_slice %1 {offsets = [0, 0], sizes = [1, 64], strides = [1, 1]} : vector<6x64xf32> to vector<1x64xf32>
    %90 = vector.broadcast %88 : vector<8x1xf32> to vector<8x64xf32>
    %91 = vector.broadcast %89 : vector<1x64xf32> to vector<8x64xf32>
    %92 = arith.mulf %90, %91 : vector<8x64xf32>
    %93 = arith.addf %87, %92 : vector<8x64xf32>
    %94 = vector.extract_strided_slice %0 {offsets = [0, 13], sizes = [8, 1], strides = [1, 1]} : vector<8x24xf32> to vector<8x1xf32>
    %95 = vector.extract_strided_slice %1 {offsets = [1, 0], sizes = [1, 64], strides = [1, 1]} : vector<6x64xf32> to vector<1x64xf32>
    %96 = vector.broadcast %94 : vector<8x1xf32> to vector<8x64xf32>
    %97 = vector.broadcast %95 : vector<1x64xf32> to vector<8x64xf32>
    %98 = arith.mulf %96, %97 : vector<8x64xf32>
    %99 = arith.addf %93, %98 : vector<8x64xf32>
    %100 = vector.extract_strided_slice %0 {offsets = [0, 14], sizes = [8, 1], strides = [1, 1]} : vector<8x24xf32> to vector<8x1xf32>
    %101 = vector.extract_strided_slice %1 {offsets = [2, 0], sizes = [1, 64], strides = [1, 1]} : vector<6x64xf32> to vector<1x64xf32>
    %102 = vector.broadcast %100 : vector<8x1xf32> to vector<8x64xf32>
    %103 = vector.broadcast %101 : vector<1x64xf32> to vector<8x64xf32>
    %104 = arith.mulf %102, %103 : vector<8x64xf32>
    %105 = arith.addf %99, %104 : vector<8x64xf32>
    %106 = vector.extract_strided_slice %0 {offsets = [0, 15], sizes = [8, 1], strides = [1, 1]} : vector<8x24xf32> to vector<8x1xf32>
    %107 = vector.extract_strided_slice %1 {offsets = [3, 0], sizes = [1, 64], strides = [1, 1]} : vector<6x64xf32> to vector<1x64xf32>
    %108 = vector.broadcast %106 : vector<8x1xf32> to vector<8x64xf32>
    %109 = vector.broadcast %107 : vector<1x64xf32> to vector<8x64xf32>
    %110 = arith.mulf %108, %109 : vector<8x64xf32>
    %111 = arith.addf %105, %110 : vector<8x64xf32>
    %112 = vector.extract_strided_slice %0 {offsets = [0, 16], sizes = [8, 1], strides = [1, 1]} : vector<8x24xf32> to vector<8x1xf32>
    %113 = vector.extract_strided_slice %1 {offsets = [4, 0], sizes = [1, 64], strides = [1, 1]} : vector<6x64xf32> to vector<1x64xf32>
    %114 = vector.broadcast %112 : vector<8x1xf32> to vector<8x64xf32>
    %115 = vector.broadcast %113 : vector<1x64xf32> to vector<8x64xf32>
    %116 = arith.mulf %114, %115 : vector<8x64xf32>
    %117 = arith.addf %111, %116 : vector<8x64xf32>
    %118 = vector.extract_strided_slice %0 {offsets = [0, 17], sizes = [8, 1], strides = [1, 1]} : vector<8x24xf32> to vector<8x1xf32>
    %119 = vector.extract_strided_slice %1 {offsets = [5, 0], sizes = [1, 64], strides = [1, 1]} : vector<6x64xf32> to vector<1x64xf32>
    %120 = vector.broadcast %118 : vector<8x1xf32> to vector<8x64xf32>
    %121 = vector.broadcast %119 : vector<1x64xf32> to vector<8x64xf32>
    %122 = arith.mulf %120, %121 : vector<8x64xf32>
    %123 = arith.addf %117, %122 : vector<8x64xf32>
    %124 = vector.broadcast %2 : vector<1x64xf32> to vector<8x64xf32>
    %125 = arith.addf %123, %124 : vector<8x64xf32>
    %cst_12 = arith.constant 0.000000e+00 : f32
    %126 = vector.broadcast %cst_12 : f32 to vector<8x64xf32>
    %127 = arith.maximumf %125, %126 : vector<8x64xf32>
    %c0_13 = arith.constant 0 : index
    %c128 = arith.constant 128 : index
    %128 = vector.load %arg9[%c0_13, %c128] : memref<8x256xf32, #tpu.memory_space<vmem>>, vector<8x64xf32>
    tpu.vector_store %arg9[%c0_13, %c128], %127 {strides = array<i32>} : memref<8x256xf32, #tpu.memory_space<vmem>>, vector<8x64xf32>,
    %cst_14 = arith.constant 0.000000e+00 : f32
    %129 = vector.broadcast %cst_14 : f32 to vector<8x64xf32>
    %130 = vector.extract_strided_slice %0 {offsets = [0, 18], sizes = [8, 1], strides = [1, 1]} : vector<8x24xf32> to vector<8x1xf32>
    %131 = vector.extract_strided_slice %1 {offsets = [0, 0], sizes = [1, 64], strides = [1, 1]} : vector<6x64xf32> to vector<1x64xf32>
    %132 = vector.broadcast %130 : vector<8x1xf32> to vector<8x64xf32>
    %133 = vector.broadcast %131 : vector<1x64xf32> to vector<8x64xf32>
    %134 = arith.mulf %132, %133 : vector<8x64xf32>
    %135 = arith.addf %129, %134 : vector<8x64xf32>
    %136 = vector.extract_strided_slice %0 {offsets = [0, 19], sizes = [8, 1], strides = [1, 1]} : vector<8x24xf32> to vector<8x1xf32>
    %137 = vector.extract_strided_slice %1 {offsets = [1, 0], sizes = [1, 64], strides = [1, 1]} : vector<6x64xf32> to vector<1x64xf32>
    %138 = vector.broadcast %136 : vector<8x1xf32> to vector<8x64xf32>
    %139 = vector.broadcast %137 : vector<1x64xf32> to vector<8x64xf32>
    %140 = arith.mulf %138, %139 : vector<8x64xf32>
    %141 = arith.addf %135, %140 : vector<8x64xf32>
    %142 = vector.extract_strided_slice %0 {offsets = [0, 20], sizes = [8, 1], strides = [1, 1]} : vector<8x24xf32> to vector<8x1xf32>
    %143 = vector.extract_strided_slice %1 {offsets = [2, 0], sizes = [1, 64], strides = [1, 1]} : vector<6x64xf32> to vector<1x64xf32>
    %144 = vector.broadcast %142 : vector<8x1xf32> to vector<8x64xf32>
    %145 = vector.broadcast %143 : vector<1x64xf32> to vector<8x64xf32>
    %146 = arith.mulf %144, %145 : vector<8x64xf32>
    %147 = arith.addf %141, %146 : vector<8x64xf32>
    %148 = vector.extract_strided_slice %0 {offsets = [0, 21], sizes = [8, 1], strides = [1, 1]} : vector<8x24xf32> to vector<8x1xf32>
    %149 = vector.extract_strided_slice %1 {offsets = [3, 0], sizes = [1, 64], strides = [1, 1]} : vector<6x64xf32> to vector<1x64xf32>
    %150 = vector.broadcast %148 : vector<8x1xf32> to vector<8x64xf32>
    %151 = vector.broadcast %149 : vector<1x64xf32> to vector<8x64xf32>
    %152 = arith.mulf %150, %151 : vector<8x64xf32>
    %153 = arith.addf %147, %152 : vector<8x64xf32>
    %154 = vector.extract_strided_slice %0 {offsets = [0, 22], sizes = [8, 1], strides = [1, 1]} : vector<8x24xf32> to vector<8x1xf32>
    %155 = vector.extract_strided_slice %1 {offsets = [4, 0], sizes = [1, 64], strides = [1, 1]} : vector<6x64xf32> to vector<1x64xf32>
    %156 = vector.broadcast %154 : vector<8x1xf32> to vector<8x64xf32>
    %157 = vector.broadcast %155 : vector<1x64xf32> to vector<8x64xf32>
    %158 = arith.mulf %156, %157 : vector<8x64xf32>
    %159 = arith.addf %153, %158 : vector<8x64xf32>
    %160 = vector.extract_strided_slice %0 {offsets = [0, 23], sizes = [8, 1], strides = [1, 1]} : vector<8x24xf32> to vector<8x1xf32>
    %161 = vector.extract_strided_slice %1 {offsets = [5, 0], sizes = [1, 64], strides = [1, 1]} : vector<6x64xf32> to vector<1x64xf32>
    %162 = vector.broadcast %160 : vector<8x1xf32> to vector<8x64xf32>
    %163 = vector.broadcast %161 : vector<1x64xf32> to vector<8x64xf32>
    %164 = arith.mulf %162, %163 : vector<8x64xf32>
    %165 = arith.addf %159, %164 : vector<8x64xf32>
    %166 = vector.broadcast %2 : vector<1x64xf32> to vector<8x64xf32>
    %167 = arith.addf %165, %166 : vector<8x64xf32>
    %cst_15 = arith.constant 0.000000e+00 : f32
    %168 = vector.broadcast %cst_15 : f32 to vector<8x64xf32>
    %169 = arith.maximumf %167, %168 : vector<8x64xf32>
    %c0_16 = arith.constant 0 : index
    %c192 = arith.constant 192 : index
    %170 = vector.load %arg9[%c0_16, %c192] : memref<8x256xf32, #tpu.memory_space<vmem>>, vector<8x64xf32>
    tpu.vector_store %arg9[%c0_16, %c192], %169 {strides = array<i32>} : memref<8x256xf32, #tpu.memory_space<vmem>>, vector<8x64xf32>,
    %c0_17 = arith.constant 0 : index
    %c0_18 = arith.constant 0 : index
    %171 = vector.load %arg9[%c0_17, %c0_18] : memref<8x256xf32, #tpu.memory_space<vmem>>, vector<8x256xf32>
    %172 = arith.truncf %171 : vector<8x256xf32> to vector<8x256xbf16>
    %c0_19 = arith.constant 0 : index
    %c0_20 = arith.constant 0 : index
    %173 = vector.load %arg4[%c0_19, %c0_20] : memref<256x256xbf16, #tpu.memory_space<vmem>>, vector<256x256xbf16>
    %cst_21 = arith.constant dense<0.000000e+00> : vector<8x256xf32>
    %174 = tpu.matmul %172, %173, %cst_21 {dimension_numbers = #tpu.dot_dimension_numbers<[1], [0], [0], [1], [0, 0, 1, 1], [], []>} : vector<8x256xbf16>, vector<256x256xbf16>, vector<8x256xf32> -> vector<8x256xf32>
    %c0_22 = arith.constant 0 : index
    %c0_23 = arith.constant 0 : index
    %175 = vector.load %arg5[%c0_22, %c0_23] : memref<1x256xf32, #tpu.memory_space<vmem>>, vector<1x256xf32>
    %176 = vector.broadcast %175 : vector<1x256xf32> to vector<8x256xf32>
    %177 = arith.addf %174, %176 : vector<8x256xf32>
    %cst_24 = arith.constant 0.000000e+00 : f32
    %178 = vector.broadcast %cst_24 : f32 to vector<8x256xf32>
    %179 = arith.maximumf %177, %178 : vector<8x256xf32>
    %180 = arith.truncf %179 : vector<8x256xf32> to vector<8x256xbf16>
    %c0_25 = arith.constant 0 : index
    %c0_26 = arith.constant 0 : index
    %181 = vector.load %arg6[%c0_25, %c0_26] : memref<256x24xbf16, #tpu.memory_space<vmem>>, vector<256x24xbf16>
    %cst_27 = arith.constant dense<0.000000e+00> : vector<8x24xf32>
    %182 = tpu.matmul %180, %181, %cst_27 {dimension_numbers = #tpu.dot_dimension_numbers<[1], [0], [0], [1], [0, 0, 1, 1], [], []>} : vector<8x256xbf16>, vector<256x24xbf16>, vector<8x24xf32> -> vector<8x24xf32>
    %c0_28 = arith.constant 0 : index
    %c0_29 = arith.constant 0 : index
    %183 = vector.load %arg7[%c0_28, %c0_29] : memref<1x24xf32, #tpu.memory_space<vmem>>, vector<1x24xf32>
    %184 = vector.broadcast %183 : vector<1x24xf32> to vector<8x24xf32>
    %185 = arith.addf %182, %184 : vector<8x24xf32>
    %c0_30 = arith.constant 0 : index
    %c0_31 = arith.constant 0 : index
    %186 = vector.load %arg8[%c0_30, %c0_31] : memref<8x24xf32, #tpu.memory_space<vmem>>, vector<8x24xf32>
    tpu.vector_store %arg8[%c0_30, %c0_31], %185 {strides = array<i32>} : memref<8x24xf32, #tpu.memory_space<vmem>>, vector<8x24xf32>,
    return
  }
  func.func @transform_0(%arg0: i32) -> (i32, i32) {
    %c0_i32 = arith.constant 0 : i32
    %c0_i32_0 = arith.constant 0 : i32
    return %arg0, %c0_i32 : i32, i32
  }
  func.func @transform_1(%arg0: i32) -> (i32, i32) {
    %c0_i32 = arith.constant 0 : i32
    %c0_i32_0 = arith.constant 0 : i32
    %c0_i32_1 = arith.constant 0 : i32
    return %c0_i32, %c0_i32_0 : i32, i32
  }
  func.func @transform_2(%arg0: i32) -> (i32, i32) {
    %c0_i32 = arith.constant 0 : i32
    %c0_i32_0 = arith.constant 0 : i32
    %c0_i32_1 = arith.constant 0 : i32
    return %c0_i32, %c0_i32_0 : i32, i32
  }
  func.func @transform_3(%arg0: i32) -> (i32, i32) {
    %c0_i32 = arith.constant 0 : i32
    %c0_i32_0 = arith.constant 0 : i32
    %c0_i32_1 = arith.constant 0 : i32
    return %c0_i32, %c0_i32_0 : i32, i32
  }
  func.func @transform_4(%arg0: i32) -> (i32, i32) {
    %c0_i32 = arith.constant 0 : i32
    %c0_i32_0 = arith.constant 0 : i32
    %c0_i32_1 = arith.constant 0 : i32
    return %c0_i32, %c0_i32_0 : i32, i32
  }
  func.func @transform_5(%arg0: i32) -> (i32, i32) {
    %c0_i32 = arith.constant 0 : i32
    %c0_i32_0 = arith.constant 0 : i32
    %c0_i32_1 = arith.constant 0 : i32
    return %c0_i32, %c0_i32_0 : i32, i32
  }
  func.func @transform_6(%arg0: i32) -> (i32, i32) {
    %c0_i32 = arith.constant 0 : i32
    %c0_i32_0 = arith.constant 0 : i32
    %c0_i32_1 = arith.constant 0 : i32
    return %c0_i32, %c0_i32_0 : i32, i32
  }
  func.func @transform_7(%arg0: i32) -> (i32, i32) {
    %c0_i32 = arith.constant 0 : i32
    %c0_i32_0 = arith.constant 0 : i32
    return %arg0, %c0_i32 : i32, i32
  }
}

</mosaic_0001>

<bundles_post_ra>
// kernel: tpu_custom_call.1
= control target key start
LH: loop header
LB: loop body
LE: loop exit
PB: predicated region body
PF: predicated region fallthrough
CT: control target
= control target key end

     0   :  { %12 = vsyncpa [#allocation4], 0  ;;  %s1165_s0 = inlined_call_operand.vmem [shape: f32[8,24], index: 0, kind: input, shape index: {}]   ;;  %s1166_s1 = inlined_call_operand.vmem [shape: f32[6,64], index: 1, kind: input, shape index: {}]   ;;  %s1167_s2 = inlined_call_operand.vmem [shape: f32[1,64], index: 2, kind: input, shape index: {}]   ;;  %s1168_s3 = inlined_call_operand.hbm [shape: bf16[256,256], index: 3, kind: input, shape index: {}]   ;;  %s1169_s4 = inlined_call_operand.vmem [shape: f32[1,256], index: 4, kind: input, shape index: {}]   ;;  %s1170_s5 = inlined_call_operand.vmem [shape: bf16[256,24], index: 5, kind: input, shape index: {}]   ;;  %s1171_s6 = inlined_call_operand.vmem [shape: f32[1,24], index: 6, kind: input, shape index: {}]   ;;  %s1172_s7 = inlined_call_operand.hbm [shape: f32[8,24], index: 7, kind: output, shape index: {}]  }
   0x1   :  { %13 = vsyncpa [#allocation5], 0  ;;  %s925_s24 = smov [#allocation3]   ;;  %s877_s28 = scalar_lea.hbm %s1168_s3, 4096 }
   0x2   :  { %s25_s25 = sshll.u32 %s925_s24, 4  ;;  %p878_p0 = scmp.ne.s32.totalorder %s1168_s3, %s877_s28  ;;  %s26_s25 = int_to_ptr.vmem [resolvable:$true] %s25_s25 }
   0x3   :  { %p881_p1 = scmp.lt.u32.totalorder %s877_s28, %s1168_s3 }
   0x5   :  { %p883_p2 = pnand %p881_p1, %p878_p0 }
   0x7   :  { %886 = shalt.err (!%p883_p2)
}
   0x8   :  { %s887_s10 = scalar_lea.vmem %s26_s25, 4096  ;;  %p892_p4 = scmp.lt.s32.totalorder %s26_s25, %s26_s25 }
   0x9   :  { %p888_p3 = scmp.ne.s32.totalorder %s26_s25, %s887_s10  ;;  %p893_p5 = scmp.lt.s32.totalorder %s887_s10, %s887_s10 }
   0xb   :  { %p894_p6 = por %p893_p5, %p892_p4 }
   0xd   :  { %p895_p7 = pnand %p894_p6, %p888_p3 }
   0xf   :  { %898 = shalt.err (!%p895_p7)
}
  0x10   :  { %s926_s11 = smov 128   ;;  %s927_s12 = smov 8  }
  0x11   :  { %31 = dma.hbm_to_vmem [thread:$0]  %s1168_s3, 4096, %s26_s25, [#allocation4], %s926_s11, %s926_s11, %s927_s12  }
  0x12   :  { %921 = dma.done.wait [#allocation4], 4096  }
  0x13   :  { %922 = vsyncadd [#allocation4], 4294963200  ;;  %v928_v0 = vmov 18   ;;  %v929_v1 = vmov 6   ;;  %v1009_v2 = vld [vmem:[%s1165_s0] sm:$0xff]  ;;  %v930_v3 = vmov 7   ;;  %v50_v52 = vlaneseq }
  0x14   :  { %788 = vset.pattern.permute.xlu0 %v928_v0  ;;  %790 = vset.pattern.permute.xlu1 %v929_v1  ;;  %v931_v4 = vmov 19   ;;  %v932_v5 = vmov 20   ;;  %v933_v6 = vmov 8   ;;  %v934_v7 = vmov 21   ;;  %v813_v20 = vld [vmem:[#allocation3 + $0x4] ss:$8 sps:$4 sm:$0xff]  }
  0x15   :  { %117 = vperm.xlu1 %790, %v1009_v2   ;;  %200 = vperm.xlu0 %788, %v1009_v2   ;;  %v935_v8 = vmov 22   ;;  %v936_v9 = vmov 9   ;;  %v937_v10 = vmov 11   ;;  %v938_v11 = vmov 10   ;;  %v815_v22 = vld [vmem:[#allocation3] ss:$8 sps:$4 sm:$0xff]  }
  0x16   :  { %v939_v12 = vmov 0   ;;  %v940_v13 = vmov 23   ;;  %v941_v14 = vmov 2   ;;  %v942_v15 = vmov 12   ;;  %450 = vmatprep.subr.bf16.mxu0 %v813_v20  ;;  %v816_v23 = vld [vmem:[#allocation3 + $0x14] ss:$8 sps:$4 sm:$0xff]  }
  0x17   :  { %v943_v16 = vmov 16   ;;  %v944_v17 = vmov 13   ;;  %v945_v18 = vmov 5   ;;  %v946_v19 = vmov 1   ;;  %451 = vmatpush1.bf16.msra.mxu0 %v815_v22  ;;  %v818_v25 = vld [vmem:[#allocation3 + $0x10] ss:$8 sps:$4 sm:$0xff]  }
  0x18   :  { %v947_v21 = vmov 14   ;;  %v948_v24 = vmov 15   ;;  %452 = vmatprep.subr.bf16.mxu0 %v816_v23  ;;  %v819_v26 = vld [vmem:[#allocation3 + $0x24] ss:$8 sps:$4 sm:$0xff]   ;;  %v949_v27 = vmov 3   ;;  %v950_v30 = vmov 4  }
  0x19   :  { %791 = vset.pattern.permute.xlu1 %v930_v3  ;;  %789 = vset.pattern.permute.xlu0 %v931_v4  ;;  %v821_v28 = vld [vmem:[#allocation3 + $0x20] ss:$8 sps:$4 sm:$0xff]   ;;  %v822_v29 = vld [vmem:[#allocation3 + $0x34] ss:$8 sps:$4 sm:$0xff]   ;;  %v824_v31 = vld [vmem:[#allocation3 + $0x30] ss:$8 sps:$4 sm:$0xff]  }
  0x1a   :  { %123 = vperm.xlu1 %791, %v1009_v2   ;;  %206 = vperm.xlu0 %789, %v1009_v2   ;;  %v825_v32 = vld [vmem:[#allocation3 + $0x44] ss:$8 sps:$4 sm:$0xff]   ;;  %v951_v33 = vmov 17   ;;  %v827_v34 = vld [vmem:[#allocation3 + $0x40] ss:$8 sps:$4 sm:$0xff]   ;;  %v1035_v55 = vshrl.u32 %v50_v52, 7 }
  0x1b   :  { %453 = vmatpush1.bf16.msra.mxu0 %v818_v25  ;;  %v828_v35 = vld [vmem:[#allocation3 + $0x54] ss:$8 sps:$4 sm:$0xff]   ;;  %v830_v36 = vld [vmem:[#allocation3 + $0x50] ss:$8 sps:$4 sm:$0xff]   ;;  %v831_v37 = vld [vmem:[#allocation3 + $0x64] ss:$8 sps:$4 sm:$0xff]  }
  0x1c   :  { %454 = vmatprep.subr.bf16.mxu0 %v819_v26  ;;  %v833_v38 = vld [vmem:[#allocation3 + $0x60] ss:$8 sps:$4 sm:$0xff]   ;;  %v834_v39 = vld [vmem:[#allocation3 + $0x74] ss:$8 sps:$4 sm:$0xff]   ;;  %v836_v40 = vld [vmem:[#allocation3 + $0x70] ss:$8 sps:$4 sm:$0xff]  }
  0x1d   :  { %v837_v41 = vld [vmem:[#allocation3 + $0x84] ss:$8 sps:$4 sm:$0xff]   ;;  %v839_v42 = vld [vmem:[#allocation3 + $0x80] ss:$8 sps:$4 sm:$0xff]   ;;  %v840_v43 = vld [vmem:[#allocation3 + $0x94] ss:$8 sps:$4 sm:$0xff]  }
  0x1e   :  { %792 = vset.pattern.permute.xlu1 %v932_v5  ;;  %793 = vset.pattern.permute.xlu0 %v933_v6  ;;  %v842_v44 = vld [vmem:[#allocation3 + $0x90] ss:$8 sps:$4 sm:$0xff]   ;;  %v843_v45 = vld [vmem:[#allocation3 + $0xa4] ss:$8 sps:$4 sm:$0xff]   ;;  %v845_v46 = vld [vmem:[#allocation3 + $0xa0] ss:$8 sps:$4 sm:$0xff]  }
  0x1f   :  { %212 = vperm.xlu1 %792, %v1009_v2   ;;  %129 = vperm.xlu0 %793, %v1009_v2   ;;  %v846_v47 = vld [vmem:[#allocation3 + $0xb4] ss:$8 sps:$4 sm:$0xff]   ;;  %v848_v48 = vld [vmem:[#allocation3 + $0xb0] ss:$8 sps:$4 sm:$0xff]   ;;  %v849_v49 = vld [vmem:[#allocation3 + $0xc4] ss:$8 sps:$4 sm:$0xff]  }
  0x20   :  { %455 = vmatpush1.bf16.msra.mxu0 %v821_v28  ;;  %v851_v50 = vld [vmem:[#allocation3 + $0xc0] ss:$8 sps:$4 sm:$0xff]   ;;  %v52_v57 = vsub.s32 0, %v1035_v55  ;;  %v62_v58 = vsub.s32 1, %v1035_v55  ;;  %v43_v59 = vld [vmem:[%s1166_s1] sm:$0x3f] }
  0x21   :  { %456 = vmatprep.subr.bf16.mxu0 %v822_v29  ;;  %v72_v61 = vsub.s32 2, %v1035_v55  ;;  %v82_v0 = vsub.s32 3, %v1035_v55  ;;  %v852_v26 = vld [vmem:[#allocation3 + $0xd4] ss:$8 sps:$4 sm:$0xff]   ;;  %s952_s18 = smov 64   ;;  %vm114_vm0 = vcmask 523264  }
  0x22   :  { %v1045_v62 = vrot.slane %v43_v59, %v52_v57  ;;  %v1049_v63 = vrot.slane %v43_v59, %v62_v58  ;;  %v864_v52 = vld [vmem:[%s1170_s5 + $0x8] sm:$0xff]   ;;  %vm158_vm1 = vcmask 1048064   ;;  %s953_s25 = smov [#allocation6]   ;;  %vm670_vm2 = vcmask 195584  }
  0x23   :  { %794 = vset.pattern.permute.xlu1 %v934_v7  ;;  %796 = vset.pattern.permute.xlu0 %v935_v8  ;;  %v1054_v4 = vrot.slane %v43_v59, %v72_v61  ;;  %v1057_v7 = vrot.slane %v43_v59, %v82_v0  ;;  %v92_v8 = vsub.s32 4, %v1035_v55  ;;  %v868_v0 = vld [vmem:[%s1170_s5 + $0x18] sm:$0xff]   ;;  %s678_s26 = sshll.u32 %s953_s25, 4  ;;  %s679_s26 = int_to_ptr.vmem [resolvable:$true] %s678_s26 }
  0x24   :  { %218 = vperm.xlu1 %794, %v1009_v2   ;;  %224 = vperm.xlu0 %796, %v1009_v2   ;;  %s899_s27 = scalar_lea.vmem %s679_s26, 128  ;;  %p904_p9 = scmp.lt.s32.totalorder %s679_s26, %s679_s26 }
  0x25   :  { %457 = vmatpush1.bf16.msra.mxu0 %v824_v31  ;;  %p900_p8 = scmp.ne.s32.totalorder %s679_s26, %s899_s27  ;;  %p905_p10 = scmp.lt.s32.totalorder %s899_s27, %s899_s27 }
  0x26   :  { %458 = vmatprep.subr.bf16.mxu0 %v825_v32 }
  0x27   :  { %p906_p11 = por %p905_p10, %p904_p9 }
  0x28   :  { %795 = vset.pattern.permute.xlu1 %v936_v9  ;;  %799 = vset.pattern.permute.xlu0 %v937_v10  ;;  %v102_v10 = vsub.s32 5, %v1035_v55 }
  0x29   :  { %135 = vperm.xlu1 %795, %v1009_v2   ;;  %147 = vperm.xlu0 %799, %v1009_v2   ;;  %p907_p12 = pnand %p906_p11, %p900_p8 }
  0x2a   :  { %459 = vmatpush1.bf16.msra.mxu0 %v827_v34  ;;  %v1068_v23 = vrot.slane %v43_v59, %v102_v10  ;;  %v855_v34 = vld [vmem:[#allocation3 + $0xe4] ss:$8 sps:$4 sm:$0xff]   ;;  %v870_v10 = vld [vmem:[%s1170_s5 + $0x20] sm:$0xff]  }
  0x2b   :  { %460 = vmatprep.subr.bf16.mxu0 %v828_v35  ;;  %v857_v35 = vld [vmem:[#allocation3 + $0xe0] ss:$8 sps:$4 sm:$0xff]  }
  0x2d   :  { %797 = vset.pattern.permute.xlu1 %v938_v11  ;;  %802 = vset.pattern.permute.xlu0 %v939_v12 }
  0x2e   :  { %141 = vperm.xlu1 %797, %v1009_v2   ;;  %47 = vperm.xlu0 %802, %v1009_v2  }
  0x2f   :  { %461 = vmatpush1.bf16.msra.mxu0 %v830_v36  ;;  %v858_v36 = vld [vmem:[#allocation3 + $0xf4] ss:$8 sps:$4 sm:$0xff]  }
  0x30   :  { %462 = vmatprep.subr.bf16.mxu0 %v831_v37 }
  0x32   :  { %798 = vset.pattern.permute.xlu1 %v940_v13  ;;  %805 = vset.pattern.permute.xlu0 %v941_v14 }
  0x33   :  { %230 = vperm.xlu1 %798, %v1009_v2   ;;  %67 = vperm.xlu0 %805, %v1009_v2  }
  0x34   :  { %463 = vmatpush1.bf16.msra.mxu0 %v833_v38 }
  0x35   :  { %464 = vmatprep.subr.bf16.mxu0 %v834_v39 }
  0x37   :  { %800 = vset.pattern.permute.xlu1 %v942_v15  ;;  %808 = vset.pattern.permute.xlu0 %v943_v16 }
  0x38   :  { %161 = vperm.xlu1 %800, %v1009_v2   ;;  %185 = vperm.xlu0 %808, %v1009_v2  }
  0x39   :  { %465 = vmatpush1.bf16.msra.mxu0 %v836_v40 }
  0x3a   :  { %466 = vmatprep.subr.bf16.mxu0 %v837_v41  ;;  %v1077_v41 = vld [vmem:[%s1167_s2] ss:$0 sm:$0xff] }
  0x3c   :  { %801 = vset.pattern.permute.xlu1 %v944_v17  ;;  %811 = vset.pattern.permute.xlu0 %v945_v18  ;;  %v1065_v18 = vrot.slane %v43_v59, %v92_v8  ;;  %v866_v59 = vld [vmem:[%s1170_s5 + $0x10] sm:$0xff]  }
  0x3d   :  { %167 = vperm.xlu1 %801, %v1009_v2   ;;  %97 = vperm.xlu0 %811, %v1009_v2  }
  0x3e   :  { %467 = vmatpush1.bf16.msra.mxu0 %v839_v42 }
  0x3f   :  { %468 = vmatprep.subr.bf16.mxu0 %v840_v43 }
  0x41   :  { %803 = vset.pattern.permute.xlu1 %v946_v19  ;;  %812 = vset.pattern.permute.xlu0 %v940_v13 }
  0x42   :  { %57 = vperm.xlu1 %803, %v1009_v2   ;;  %469 = vmatpush1.bf16.msra.mxu0 %v842_v44  ;;  %v860_v44 = vld [vmem:[#allocation3 + $0xf0] ss:$8 sps:$4 sm:$0xff]  }
  0x43   :  { %470 = vmatprep.subr.bf16.mxu0 %v843_v45 }
  0x46   :  { %804 = vset.pattern.permute.xlu1 %v947_v21  ;;  %471 = vmatpush1.bf16.msra.mxu0 %v845_v46 }
  0x47   :  { %173 = vperm.xlu1 %804, %v1009_v2   ;;  %472 = vmatprep.subr.bf16.mxu0 %v846_v47 }
  0x4a   :  { %473 = vmatpush1.bf16.msra.mxu0 %v848_v48  ;;  %v861_v48 = vld [vmem:[%s1170_s5 + $0x40] sm:$0xff]  }
  0x4b   :  { %806 = vset.pattern.permute.xlu1 %v948_v24  ;;  %474 = vmatprep.subr.bf16.mxu0 %v849_v49  ;;  %v862_v49 = vld [vmem:[%s1170_s5] sm:$0xff]  }
  0x4c   :  { %179 = vperm.xlu1 %806, %v1009_v2   ;;  %737 = vmatprep.subr.bf16.mxu1 %v861_v48 }
  0x4d   :  { %738 = vmatpush3.bf16.msra.mxu1 %v862_v49 }
  0x4e   :  { %475 = vmatpush1.bf16.msra.mxu0 %v851_v50  ;;  %v863_v50 = vld [vmem:[%s1170_s5 + $0x48] sm:$0xff]  }
  0x4f   :  { %476 = vmatprep.subr.bf16.mxu0 %v852_v26  ;;  %739 = vmatprep.subr.bf16.mxu1 %v863_v50 }
  0x50   :  { %807 = vset.pattern.permute.xlu1 %v949_v27  ;;  %v854_v27 = vld [vmem:[#allocation3 + $0xd0] ss:$8 sps:$4 sm:$0xff]  }
  0x51   :  { %77 = vperm.xlu1 %807, %v1009_v2   ;;  %740 = vmatpush3.bf16.msra.mxu1 %v864_v52 }
  0x52   :  { %477 = vmatpush1.bf16.msra.mxu0 %v854_v27 }
  0x53   :  { %478 = vmatprep.subr.bf16.mxu0 %v855_v34 }
  0x55   :  { %809 = vset.pattern.permute.xlu1 %v950_v30 }
  0x56   :  { %87 = vperm.xlu1 %809, %v1009_v2   ;;  %479 = vmatpush1.bf16.msra.mxu0 %v857_v35 }
  0x57   :  { %480 = vmatprep.subr.bf16.mxu0 %v858_v36 }
  0x5a   :  { %810 = vset.pattern.permute.xlu1 %v951_v33  ;;  %481 = vmatpush1.bf16.msra.mxu0 %v860_v44  ;;  %v875_v44 = vld [vmem:[%s1170_s5 + $0x78] sm:$0xff]  }
  0x5b   :  { %191 = vperm.xlu1 %810, %v1009_v2  }
  0x94   :  { %v118_v51 = vpop.permute.xlu1 %117  ;;  %v201_v54 = vpop.permute.xlu0 %200 }
  0x95   :  { %v203_v2 = vmul.f32 %v201_v54, %v1045_v62  ;;  %v120_v11 = vmul.f32 %v118_v51, %v1045_v62 }
  0x99   :  { %v124_v53 = vpop.permute.xlu1 %123  ;;  %v207_v60 = vpop.permute.xlu0 %206 }
  0x9a   :  { %v209_v3 = vmul.f32 %v207_v60, %v1049_v63  ;;  %v126_v6 = vmul.f32 %v124_v53, %v1049_v63  ;;  %v865_v53 = vld [vmem:[%s1170_s5 + $0x50] sm:$0xff]   ;;  %v867_v60 = vld [vmem:[%s1170_s5 + $0x58] sm:$0xff]  }
  0x9b   :  { %741 = vmatprep.subr.bf16.mxu1 %v865_v53 }
  0x9c   :  { %v210_v12 = vadd.f32 %v209_v3, %v203_v2  ;;  %v127_v16 = vadd.f32 %v126_v6, %v120_v11  ;;  %742 = vmatpush3.bf16.msra.mxu1 %v866_v59  ;;  %v869_v3 = vld [vmem:[%s1170_s5 + $0x60] sm:$0xff]  }
  0x9d   :  { %743 = vmatprep.subr.bf16.mxu1 %v867_v60 }
  0x9e   :  { %v213_v56 = vpop.permute.xlu1 %212  ;;  %v130_v5 = vpop.permute.xlu0 %129 }
  0x9f   :  { %v215_v13 = vmul.f32 %v213_v56, %v1054_v4  ;;  %v132_v14 = vmul.f32 %v130_v5, %v1054_v4 }
  0xa0   :  { %744 = vmatpush3.bf16.msra.mxu1 %v868_v0 }
  0xa1   :  { %v216_v20 = vadd.f32 %v215_v13, %v210_v12  ;;  %v133_v21 = vadd.f32 %v132_v14, %v127_v16  ;;  %745 = vmatprep.subr.bf16.mxu1 %v869_v3  ;;  %v871_v13 = vld [vmem:[%s1170_s5 + $0x68] sm:$0xff]  }
  0xa3   :  { %v219_v1 = vpop.permute.xlu1 %218  ;;  %v225_v15 = vpop.permute.xlu0 %224 }
  0xa4   :  { %v221_v17 = vmul.f32 %v219_v1, %v1057_v7  ;;  %v227_v29 = vmul.f32 %v225_v15, %v1065_v18  ;;  %746 = vmatpush3.bf16.msra.mxu1 %v870_v10 }
  0xa5   :  { %747 = vmatprep.subr.bf16.mxu1 %v871_v13 }
  0xa6   :  { %v222_v28 = vadd.f32 %v221_v17, %v216_v20 }
  0xa8   :  { %v136_v9 = vpop.permute.xlu1 %135  ;;  %v148_v25 = vpop.permute.xlu0 %147  ;;  %v228_v37 = vadd.f32 %v227_v29, %v222_v28 }
  0xa9   :  { %v138_v19 = vmul.f32 %v136_v9, %v1057_v7  ;;  %v150_v32 = vmul.f32 %v148_v25, %v1068_v23 }
  0xab   :  { %v139_v30 = vadd.f32 %v138_v19, %v133_v21 }
  0xad   :  { %v142_v22 = vpop.permute.xlu1 %141  ;;  %v48_v56 = vpop.permute.xlu0 %47 }
  0xae   :  { %v144_v24 = vmul.f32 %v142_v22, %v1065_v18  ;;  %v54_v2 = vmul.f32 %v1045_v62, %v48_v56 }
  0xb0   :  { %v145_v31 = vadd.f32 %v144_v24, %v139_v30 }
  0xb2   :  { %v231_v33 = vpop.permute.xlu1 %230  ;;  %v151_v39 = vadd.f32 %v150_v32, %v145_v31  ;;  %v68_v8 = vpop.permute.xlu0 %67 }
  0xb3   :  { %v233_v38 = vmul.f32 %v231_v33, %v1068_v23  ;;  %v74_v12 = vmul.f32 %v1054_v4, %v68_v8 }
  0xb4   :  { %v152_v46 = vadd.f32 %v1077_v41, %v151_v39 }
  0xb5   :  { %v234_v40 = vadd.f32 %v233_v38, %v228_v37 }
  0xb6   :  { %v153_v51 = vmax.f32 %v152_v46, 0.0  ;;  %v278_v46 = vld [vmem:[%s1169_s4] sm:$0x3] }
  0xb7   :  { %v235_v42 = vadd.f32 %v1077_v41, %v234_v40  ;;  %v162_v43 = vpop.permute.xlu1 %161  ;;  %v186_v15 = vpop.permute.xlu0 %185  ;;  %v287_v48 = vrot.slane %v278_v46, %v62_v58 }
  0xb8   :  { %v164_v5 = vmul.f32 %v162_v43, %v1045_v62  ;;  %v873_v43 = vld [vmem:[%s1170_s5 + $0x70] sm:$0xff]  }
  0xb9   :  { %v236_v45 = vmax.f32 %v235_v42, 0.0 }
  0xbb   :  { %238 = vrot.lane.b32.xlu1 %v236_v45, %s952_s18  ;;  %v876_v45 = vld [vmem:[%s1170_s5 + $0x38] sm:$0xff]  }
  0xbc   :  { %v168_v47 = vpop.permute.xlu1 %167  ;;  %v98_v22 = vpop.permute.xlu0 %97 }
  0xbd   :  { %v170_v6 = vmul.f32 %v168_v47, %v1049_v63  ;;  %v104_v28 = vmul.f32 %v1068_v23, %v98_v22  ;;  %v283_v47 = vrot.slane %v278_v46, %v52_v57  ;;  %v720_v57 = vld [vmem:[%s1171_s6] ss:$0 sm:$0xff] }
  0xbf   :  { %155 = vrot.lane.b32.xlu1 %v153_v51, %s952_s18  ;;  %v171_v14 = vadd.f32 %v170_v6, %v164_v5 }
  0xc1   :  { %v58_v54 = vpop.permute.xlu1 %57 }
  0xc2   :  { %v64_v1 = vmul.f32 %v1049_v63, %v58_v54  ;;  %v872_v63 = vld [vmem:[%s1170_s5 + $0x28] sm:$0xff]  }
  0xc3   :  { %748 = vmatpush3.bf16.msra.mxu1 %v872_v63 }
  0xc4   :  { %v65_v11 = vadd.f32 %v64_v1, %v54_v2  ;;  %749 = vmatprep.subr.bf16.mxu1 %v873_v43 }
  0xc6   :  { %v174_v61 = vpop.permute.xlu1 %173  ;;  %v75_v17 = vadd.f32 %v74_v12, %v65_v11 }
  0xc7   :  { %v176_v62 = vmul.f32 %v174_v61, %v1054_v4  ;;  %v188_v4 = vmul.f32 %v186_v15, %v1065_v18 }
  0xc9   :  { %v177_v19 = vadd.f32 %v176_v62, %v171_v14 }
  0xcb   :  { %v180_v9 = vpop.permute.xlu1 %179 }
  0xcc   :  { %v182_v20 = vmul.f32 %v180_v9, %v1057_v7 }
  0xce   :  { %v183_v25 = vadd.f32 %v182_v20, %v177_v19 }
  0xd0   :  { %v78_v16 = vpop.permute.xlu1 %77  ;;  %v189_v30 = vadd.f32 %v188_v4, %v183_v25 }
  0xd1   :  { %v84_v21 = vmul.f32 %v1057_v7, %v78_v16 }
  0xd3   :  { %v85_v24 = vadd.f32 %v84_v21, %v75_v17 }
  0xd5   :  { %v88_v26 = vpop.permute.xlu1 %87 }
  0xd6   :  { %v94_v27 = vmul.f32 %v1065_v18, %v88_v26 }
  0xd8   :  { %v95_v29 = vadd.f32 %v94_v27, %v85_v24 }
  0xda   :  { %v192_v31 = vpop.permute.xlu1 %191  ;;  %v105_v32 = vadd.f32 %v104_v28, %v95_v29 }
  0xdb   :  { %v194_v33 = vmul.f32 %v192_v31, %v1068_v23 }
  0xdc   :  { %v112_v34 = vadd.f32 %v1077_v41, %v105_v32 }
  0xdd   :  { %v195_v7 = vadd.f32 %v194_v33, %v189_v30 }
  0xde   :  { %v113_v35 = vmax.f32 %v112_v34, 0.0 }
  0xdf   :  { %v196_v36 = vadd.f32 %v1077_v41, %v195_v7  ;;  %v874_v41 = vld [vmem:[%s1170_s5 + $0x30] sm:$0xff]  }
  0xe0   :  { %115 = vst.msk [vmem:[#allocation2] sm:$0xff] %vm114_vm0, %v113_v35  ;;  %750 = vmatpush3.bf16.msra.mxu1 %v874_v41 }
  0xe1   :  { %v197_v37 = vmax.f32 %v196_v36, 0.0  ;;  %751 = vmatprep.subr.bf16.mxu1 %v875_v44 }
  0xe3   :  { %198 = vst.msk [vmem:[#allocation2 + $0x8] sm:$0xff] %vm114_vm0, %v197_v37 }
  0xe4   :  { %752 = vmatpush3.bf16.msra.mxu1 %v876_v45 }
 0x12d   :  { %v239_v18 = vpop.permute.xlu1 %238 }
 0x12e   :  { %241 = vst.msk [vmem:[#allocation2 + $0x8] sm:$0xff] %vm158_vm1, %v239_v18 }
 0x131   :  { %v156_v38 = vpop.permute.xlu1 %155 }
 0x132   :  { %159 = vst.msk [vmem:[#allocation2] sm:$0xff] %vm158_vm1, %v156_v38 }
 0x135   :  { %v243_v39 = vld [vmem:[#allocation2 + $0x8] sm:$0xff] }
 0x136   :  { %v245_v40 = vpack.c.bf16 %v243_v39, %v243_v39 }
 0x138   :  { %482 = vmatprep.mubr.bf16.mxu0 %v245_v40 }
 0x139   :  { %v242_v42 = vld [vmem:[#allocation2] sm:$0xff] }
 0x13a   :  { %v244_v23 = vpack.c.bf16 %v242_v42, %v242_v42 }
 0x13c   :  { %483 = vmatmul.mubr.bf16.vlgmr.msra.gmra.mrb[0].mxu0 %v244_v23 }
 0x20f   :  { %v484_v49 = vpop.f32.mrb[0].mxu0 }
 0x210   :  { %v485_v50 = vadd.f32 %v484_v49, %v283_v47  ;;  %v486_v51 = vpop.f32.mrb[1].mxu0 }
 0x211   :  { %v487_v52 = vadd.f32 %v486_v51, %v287_v48  ;;  %v488_v53 = vpop.f32.mrb[2].mxu0 }
 0x212   :  { %v491_v54 = vmax.f32 %v485_v50, 0.0  ;;  %v489_v56 = vpop.f32.mrb[3].mxu0 }
 0x213   :  { %v492_v59 = vmax.f32 %v487_v52, 0.0 }
 0x214   :  { %v493_v61 = vpack.c.bf16 %v491_v54, %v491_v54 }
 0x215   :  { %v494_v60 = vpack.c.bf16 %v492_v59, %v492_v59 }
 0x217   :  { %662 = vmatprep.mubr.bf16.mxu1 %v494_v60 }
 0x218   :  { %663 = vmatmul.mubr.bf16.vlgmr.msra.gmra.mrb[0].mxu1 %v493_v61 }
 0x2eb   :  { %v753_v0 = vpop.f32.mrb[0].mxu1 }
 0x2ec   :  { %v754_v1 = vpop.f32.mrb[1].mxu1 }
 0x2ed   :  { %v755_v55 = vadd.f32 %v754_v1, %v753_v0  ;;  %v756_v58 = vpop.f32.mrb[2].mxu1 }
 0x2ee   :  { %v757_v2 = vpop.f32.mrb[3].mxu1 }
 0x2ef   :  { %v665_v3 = vadd.f32 %v755_v55, %v720_v57 }
 0x2f1   :  { %671 = vst.msk [vmem:[#allocation6] sm:$0xff] %vm670_vm2, %v665_v3 }
 0x2f2   :  { %910 = shalt.err (!%p907_p12)
}
 0x2f3   :  { %s911_s6 = scalar_lea.hbm %s1172_s7, 128 }
 0x2f4   :  { %p912_p13 = scmp.ne.s32.totalorder %s1172_s7, %s911_s6  ;;  %p915_p0 = scmp.lt.u32.totalorder %s911_s6, %s1172_s7 }
 0x2f6   :  { %p917_p1 = pnand %p915_p0, %p912_p13 }
 0x2f8   :  { %920 = shalt.err (!%p917_p1)
}
 0x2f9   :  { %681 = dma.vmem_to_hbm [thread:$0]  %s679_s26, 128, %s1172_s7, [#allocation5]  }
 0x2fa   :  { %923 = dma.done.wait [#allocation5], 128  }
 0x2fb   :  { %924 = vsyncadd [#allocation5], 4294967168 }
 0x2fc   :  { %685 = vsyncpa [#allocation4], 1 }
 0x2fd   :  { %686 = vsyncpa [#allocation5], 1 }

</bundles_post_ra>
